<compile_context>
chip_gen: v7x
topology: tpu7x:2x2x1
jax: 0.10.0
libtpu: 0.0.40
codegen_flags: <defaults>
</compile_context>

<pallas_src>
import jax
import jax.numpy as jnp
from jax.experimental import pallas as pl
from jax.experimental.pallas import tpu as pltpu

_VMEM_LIMIT_BYTES = 32 * 1024 * 1024
_HI = jax.lax.Precision.HIGHEST


def _round_up(a, b):
    return ((a + b - 1) // b) * b


# ----------------------------------------------------------------------------
# Phase 1: pooled weighted row-sum   xsum[0, :] = sum_i c[i] * x[i, :]
# ----------------------------------------------------------------------------
def _pool_sum_kernel(c_ref, x_ref, out_ref, acc_ref):
    i = pl.program_id(0)

    @pl.when(i == 0)
    def _init():
        acc_ref[...] = jnp.zeros_like(acc_ref)

    acc_ref[...] += jnp.sum(c_ref[...] * x_ref[...], axis=0, keepdims=True)

    @pl.when(i == pl.num_programs(0) - 1)
    def _finalize():
        out_ref[...] = acc_ref[...]


# ----------------------------------------------------------------------------
# Phase 2: elementwise DyReLU-A activation  y = max_j (a_j * x + b_j)
# ----------------------------------------------------------------------------
def _dyrelu_apply_kernel(coef_ref, x_ref, out_ref):
    """Flat, lane-dense elementwise kernel.  coef_ref is a [2k] f32 SMEM ref
    (scalar-prefetched): reading scalars from SMEM keeps the body pure VPU
    fma + max with no lane extracts/broadcasts."""
    k = coef_ref.shape[0] // 2
    x = x_ref[...]
    out = x * coef_ref[0] + coef_ref[k]
    for j in range(1, k):
        out = jnp.maximum(out, x * coef_ref[j] + coef_ref[k + j])
    out_ref[...] = out


# ----------------------------------------------------------------------------
# O(E) graph normalization (PyG gcn_norm semantics) and the tiny MLP head.
# ----------------------------------------------------------------------------
def _gcn_colsum(n, edge_index):
    """colsum of A_norm = D^-1/2 (A + I) D^-1/2 in O(E).

    PyG gcn_norm / add_remaining_self_loops convention: duplicate edges each
    count, and every node has exactly one weight-1 self loop."""
    src = edge_index[0]
    dst = edge_index[1]
    not_self = (src != dst).astype(jnp.float32)
    deg = 1.0 + jax.ops.segment_sum(not_self, dst, num_segments=n)
    dinv = jax.lax.rsqrt(deg)                                    # deg >= 1
    nbr = jax.ops.segment_sum(not_self * dinv[dst], src, num_segments=n)
    return dinv * (dinv + nbr)                                   # [N] f32


def _coefs_from_xsum(xsum, n, w1, b1, w2, b2, lambdas, init_v):
    """mean_i h[i,:] -> ReLU -> fc2 -> 2*sigmoid-1 -> lambdas/init_v."""
    theta = jnp.dot(xsum, w1, precision=_HI) / float(n) + b1     # [1, H]
    theta = jnp.maximum(theta, 0.0)
    theta = jnp.dot(theta, w2, precision=_HI) + b2               # [1, 2k]
    theta = 2.0 * jax.nn.sigmoid(theta) - 1.0
    return (theta * lambdas + init_v).reshape(-1)                # [2k] f32


# ----------------------------------------------------------------------------
# Forward wrapper.
# ----------------------------------------------------------------------------
def dyrelu_a_forward(x, edge_index, w1, b1, w2, b2, lambdas, init_v):
    """x: [N, C] f32, edge_index: [2, E] int32. Returns [N, C] f32."""
    n, c = x.shape
    xf = x.astype(jnp.float32)

    # ---- O(E) normalization; then phase 1: xsum = colsum(A_norm) @ X --------
    # TODO(synk): the segment-sum degree/colsum scatter stays in XLA (data-
    # dependent gather/scatter has no clean static BlockSpec expression here).
    col = _gcn_colsum(n, edge_index)

    pool_tile = min(4096, _round_up(n, 8))
    n_pad = _round_up(n, pool_tile)
    x_pool = jnp.pad(xf, ((0, n_pad - n), (0, 0)))               # [Np, C]
    c_pool = jnp.pad(col, (0, n_pad - n))[:, None]               # [Np, 1]

    xsum = pl.pallas_call(
        _pool_sum_kernel,
        out_shape=jax.ShapeDtypeStruct((1, c), jnp.float32),
        grid_spec=pltpu.PrefetchScalarGridSpec(
            num_scalar_prefetch=0,
            grid=(n_pad // pool_tile,),                          # node tiles
            in_specs=[
                pl.BlockSpec((pool_tile, 1), lambda i: (i, 0)),  # colsum weights
                pl.BlockSpec((pool_tile, c), lambda i: (i, 0)),  # X rows
            ],
            out_specs=pl.BlockSpec((1, c), lambda i: (0, 0)),
            scratch_shapes=[pltpu.VMEM((1, c), jnp.float32)],
        ),
        compiler_params=pltpu.CompilerParams(
            dimension_semantics=("arbitrary",),
            vmem_limit_bytes=_VMEM_LIMIT_BYTES),
    )(c_pool, x_pool)

    # ---- tiny [1,C] -> [1,2k] head in plain JAX ------------------------------
    coefs = _coefs_from_xsum(xsum, n, w1, b1, w2, b2, lambdas, init_v)

    # ---- phase 2: flat elementwise DyReLU, coefs scalar-prefetched ----------
    lane = 1024                                  # lane-dense stores
    total = n * c
    rows = (total + lane - 1) // lane
    row_tile = min(32, _round_up(rows, 8))       # 32 x 1024 = 32K elem / block
    rows_pad = _round_up(rows, row_tile)
    x_flat = jnp.pad(xf.reshape(-1), (0, rows_pad * lane - total))
    x_flat = x_flat.reshape(rows_pad, lane)

    y_flat = pl.pallas_call(
        _dyrelu_apply_kernel,
        out_shape=jax.ShapeDtypeStruct((rows_pad, lane), jnp.float32),
        grid_spec=pltpu.PrefetchScalarGridSpec(
            num_scalar_prefetch=1,                               # coefs -> SMEM
            grid=(rows_pad // row_tile,),
            in_specs=[pl.BlockSpec((row_tile, lane), lambda i, coef: (i, 0))],
            out_specs=pl.BlockSpec((row_tile, lane), lambda i, coef: (i, 0)),
        ),
        compiler_params=pltpu.CompilerParams(
            dimension_semantics=("parallel",),
            vmem_limit_bytes=_VMEM_LIMIT_BYTES),
    )(coefs, x_flat)

    return y_flat.reshape(-1)[:total].reshape(n, c)


# ----------------------------------------------------------------------------
# Pure-JAX dense reference (mirrors the PyTorch forward / PyG gcn_norm).
# ----------------------------------------------------------------------------
def dyrelu_a_reference(x, edge_index, w1, b1, w2, b2, lambdas, init_v):
    n = x.shape[0]
    src, dst = edge_index[0], edge_index[1]
    w = (src != dst).astype(jnp.float32)
    a = jnp.zeros((n, n), jnp.float32).at[dst, src].add(w)       # count dups
    a = a + jnp.eye(n, dtype=jnp.float32)                        # one self loop
    deg = jnp.sum(a, axis=1)
    dinv = jnp.where(deg > 0, jax.lax.rsqrt(deg), 0.0)
    a_norm = dinv[:, None] * a * dinv[None, :]
    h = jnp.dot(a_norm, jnp.dot(x, w1, precision=_HI), precision=_HI) + b1
    theta = jnp.maximum(jnp.mean(h, axis=0, keepdims=True), 0.0)
    theta = jnp.dot(theta, w2, precision=_HI) + b2
    theta = 2.0 * jax.nn.sigmoid(theta) - 1.0
    coefs = (theta * lambdas + init_v).reshape(-1)
    k = lambdas.shape[-1] // 2
    out = x[:, :, None] * coefs[:k] + coefs[k:]
    return jnp.max(out, axis=-1)


if __name__ == "__main__":
    # Module hyper-parameters (defaults of DyReLUA).
    channels, reduction, k = 8, 4, 2
    hidden = channels // reduction                       # 2
    n_nodes, n_edges = 512, 2048

    key = jax.random.PRNGKey(0)
    key_x, key_e, key_w1, key_b1, key_w2, key_b2 = jax.random.split(key, 6)

    x = jax.random.normal(key_x, (n_nodes, channels), jnp.float32)
    edge_index = jax.random.randint(key_e, (2, n_edges), 0, n_nodes,
                                    dtype=jnp.int32)

    w1 = jax.random.normal(key_w1, (channels, hidden), jnp.float32) * 0.2   # GCNConv W
    b1 = jax.random.normal(key_b1, (1, hidden), jnp.float32) * 0.1          # GCNConv b
    w2 = jax.random.normal(key_w2, (hidden, 2 * k), jnp.float32) * 0.2      # fc2 W
    b2 = jax.random.normal(key_b2, (1, 2 * k), jnp.float32) * 0.1           # fc2 b
    lambdas = jnp.array([[1.0] * k + [0.5] * k], jnp.float32)               # [1, 2k]
    init_v = jnp.array([[1.0] + [0.0] * (2 * k - 1)], jnp.float32)          # [1, 2k]

    out = dyrelu_a_forward(x, edge_index, w1, b1, w2, b2, lambdas, init_v)
    jax.block_until_ready(out)
    assert out.shape == (n_nodes, channels)

    ref = dyrelu_a_reference(x, edge_index, w1, b1, w2, b2, lambdas, init_v)
    err = float(jnp.max(jnp.abs(out - ref)))
    assert jnp.allclose(out, ref, atol=1e-4, rtol=1e-4), err

    print("KERNEL_OK")
</pallas_src>

<mosaic_0001>
module attributes {stable_mosaic.version = 11 : i64} {
  func.func @_pool_sum_kernel(%arg0: i32, %arg1: memref<512x1xf32, #tpu.memory_space<vmem>>, %arg2: memref<512x8xf32, #tpu.memory_space<vmem>>, %arg3: memref<1x8xf32, #tpu.memory_space<vmem>>, %arg4: memref<1x8xf32, #tpu.memory_space<vmem>>) attributes {dimension_semantics = [#tpu.dimension_semantics<arbitrary>], iteration_bounds = array<i64: 1>, scalar_prefetch = 0 : i64, scratch_operands = 1 : i64, tpu.core_type = #tpu.core_type<tc>, window_params = [{transform_indices = @transform_0, window_bounds = array<i64: 512, 1>}, {transform_indices = @transform_1, window_bounds = array<i64: 512, 8>}, {pipeline_mode = #tpu.pipeline_mode<synchronous>, transform_indices = @transform_2, window_bounds = array<i64: 1, 8>}]} {
    %c0_i32 = arith.constant 0 : i32
    %0 = arith.cmpi eq, %arg0, %c0_i32 : i32
    %1 = arith.extui %0 : i1 to i32
    %c0_i32_0 = arith.constant 0 : i32
    %2 = arith.cmpi ne, %1, %c0_i32_0 : i32
    scf.if %2 {
      %cst_10 = arith.constant 0.000000e+00 : f32
      %15 = vector.broadcast %cst_10 : f32 to vector<1x8xf32>
      %c0_11 = arith.constant 0 : index
      %c0_12 = arith.constant 0 : index
      %16 = vector.load %arg4[%c0_11, %c0_12] : memref<1x8xf32, #tpu.memory_space<vmem>>, vector<1x8xf32>
      tpu.vector_store %arg4[%c0_11, %c0_12], %15 {strides = array<i32>} : memref<1x8xf32, #tpu.memory_space<vmem>>, vector<1x8xf32>,
    } else {
    }
    %c0 = arith.constant 0 : index
    %c0_1 = arith.constant 0 : index
    %3 = vector.load %arg4[%c0, %c0_1] : memref<1x8xf32, #tpu.memory_space<vmem>>, vector<1x8xf32>
    %c0_2 = arith.constant 0 : index
    %c0_3 = arith.constant 0 : index
    %4 = vector.load %arg1[%c0_2, %c0_3] : memref<512x1xf32, #tpu.memory_space<vmem>>, vector<512x1xf32>
    %c0_4 = arith.constant 0 : index
    %c0_5 = arith.constant 0 : index
    %5 = vector.load %arg2[%c0_4, %c0_5] : memref<512x8xf32, #tpu.memory_space<vmem>>, vector<512x8xf32>
    %6 = vector.broadcast %4 : vector<512x1xf32> to vector<512x8xf32>
    %7 = arith.mulf %6, %5 : vector<512x8xf32>
    %cst = arith.constant dense<0.000000e+00> : vector<8xf32>
    %8 = vector.multi_reduction <add>, %7, %cst [0] : vector<512x8xf32> to vector<8xf32>
    %9 = vector.shape_cast %8 : vector<8xf32> to vector<1x8xf32>
    %10 = arith.addf %3, %9 : vector<1x8xf32>
    %c0_6 = arith.constant 0 : index
    %c0_7 = arith.constant 0 : index
    %11 = vector.load %arg4[%c0_6, %c0_7] : memref<1x8xf32, #tpu.memory_space<vmem>>, vector<1x8xf32>
    tpu.vector_store %arg4[%c0_6, %c0_7], %10 {strides = array<i32>} : memref<1x8xf32, #tpu.memory_space<vmem>>, vector<1x8xf32>,
    %c0_i32_8 = arith.constant 0 : i32
    %12 = arith.cmpi eq, %arg0, %c0_i32_8 : i32
    %13 = arith.extui %12 : i1 to i32
    %c0_i32_9 = arith.constant 0 : i32
    %14 = arith.cmpi ne, %13, %c0_i32_9 : i32
    scf.if %14 {
      %c0_10 = arith.constant 0 : index
      %c0_11 = arith.constant 0 : index
      %15 = vector.load %arg4[%c0_10, %c0_11] : memref<1x8xf32, #tpu.memory_space<vmem>>, vector<1x8xf32>
      %c0_12 = arith.constant 0 : index
      %c0_13 = arith.constant 0 : index
      %16 = vector.load %arg3[%c0_12, %c0_13] : memref<1x8xf32, #tpu.memory_space<vmem>>, vector<1x8xf32>
      tpu.vector_store %arg3[%c0_12, %c0_13], %15 {strides = array<i32>} : memref<1x8xf32, #tpu.memory_space<vmem>>, vector<1x8xf32>,
    } else {
    }
    return
  }
  func.func @transform_0(%arg0: i32) -> (i32, i32) {
    %c0_i32 = arith.constant 0 : i32
    %c0_i32_0 = arith.constant 0 : i32
    return %arg0, %c0_i32 : i32, i32
  }
  func.func @transform_1(%arg0: i32) -> (i32, i32) {
    %c0_i32 = arith.constant 0 : i32
    %c0_i32_0 = arith.constant 0 : i32
    return %arg0, %c0_i32 : i32, i32
  }
  func.func @transform_2(%arg0: i32) -> (i32, i32) {
    %c0_i32 = arith.constant 0 : i32
    %c0_i32_0 = arith.constant 0 : i32
    %c0_i32_1 = arith.constant 0 : i32
    return %c0_i32, %c0_i32_0 : i32, i32
  }
}

</mosaic_0001>

<bundles_post_ra>
// kernel: tpu_custom_call.1
= control target key start
LH: loop header
LB: loop body
LE: loop exit
PB: predicated region body
PF: predicated region fallthrough
CT: control target
= control target key end

     0   :  { %v716_v2 = vmov 0   ;;  %s1197_s0 = inlined_call_operand.vmem [shape: f32[512,1], index: 0, kind: input, shape index: {}]   ;;  %s1198_s1 = inlined_call_operand.vmem [shape: f32[512,8], index: 1, kind: input, shape index: {}]   ;;  %s1199_s2 = inlined_call_operand.hbm [shape: f32[1,8], index: 2, kind: output, shape index: {}]  }
   0x1   :  { %v21_v0 = vld [vmem:[%s1197_s0 + $0x10] sm:$0xff]  ;;  %v19_v1 = vld [vmem:[%s1197_s0] sm:$0xff]  ;;  %691 = vset.pattern.permute.xlu1 %v716_v2  ;;  %690 = vset.pattern.permute.xlu0 %v716_v2  ;;  %v22_v3 = vld [vmem:[%s1197_s0 + $0x18] sm:$0xff] }
   0x2   :  { %159 = vperm.xlu1 %691, %v21_v0   ;;  %149 = vperm.xlu0 %690, %v19_v1   ;;  %v20_v4 = vld [vmem:[%s1197_s0 + $0x8] sm:$0xff]  ;;  %v23_v6 = vld [vmem:[%s1197_s0 + $0x20] sm:$0xff]  ;;  %v26_v7 = vld [vmem:[%s1197_s0 + $0x38] sm:$0xff] }
   0x3   :  { %v24_v5 = vld [vmem:[%s1197_s0 + $0x28] sm:$0xff]  ;;  %v25_v8 = vld [vmem:[%s1197_s0 + $0x30] sm:$0xff]  ;;  %v27_v10 = vld [vmem:[%s1197_s0 + $0x40] sm:$0xff] }
   0x4   :  { %v28_v9 = vld [vmem:[%s1197_s0 + $0x48] sm:$0xff]  ;;  %v30_v11 = vld [vmem:[%s1197_s0 + $0x58] sm:$0xff]  ;;  %v29_v12 = vld [vmem:[%s1197_s0 + $0x50] sm:$0xff] }
   0x5   :  { %v32_v13 = vld [vmem:[%s1197_s0 + $0x68] sm:$0xff]  ;;  %v31_v14 = vld [vmem:[%s1197_s0 + $0x60] sm:$0xff] }
   0x6   :  { %164 = vperm.xlu1 %691, %v22_v3   ;;  %154 = vperm.xlu0 %690, %v20_v4  }
   0xa   :  { %174 = vperm.xlu1 %691, %v24_v5   ;;  %169 = vperm.xlu0 %690, %v23_v6  }
   0xe   :  { %184 = vperm.xlu1 %691, %v26_v7   ;;  %179 = vperm.xlu0 %690, %v25_v8  }
  0x12   :  { %194 = vperm.xlu1 %691, %v28_v9   ;;  %189 = vperm.xlu0 %690, %v27_v10  }
  0x16   :  { %204 = vperm.xlu1 %691, %v30_v11   ;;  %199 = vperm.xlu0 %690, %v29_v12  }
  0x1a   :  { %214 = vperm.xlu1 %691, %v32_v13   ;;  %209 = vperm.xlu0 %690, %v31_v14  }
  0x1b   :  { %7 = vsyncpa [#allocation4], 0  ;;  %v34_v15 = vld [vmem:[%s1197_s0 + $0x78] sm:$0xff]  ;;  %v33_v16 = vld [vmem:[%s1197_s0 + $0x70] sm:$0xff]  ;;  %vm531_vm0 = vcmask 64512   ;;  %vm16_vm1 = vcmask 57344  }
  0x1c   :  { %v36_v17 = vld [vmem:[%s1197_s0 + $0x88] sm:$0xff]  ;;  %v35_v18 = vld [vmem:[%s1197_s0 + $0x80] sm:$0xff]  ;;  %v38_v19 = vld [vmem:[%s1197_s0 + $0x98] sm:$0xff] }
  0x1d   :  { %v37_v20 = vld [vmem:[%s1197_s0 + $0x90] sm:$0xff]  ;;  %v40_v21 = vld [vmem:[%s1197_s0 + $0xa8] sm:$0xff]  ;;  %v39_v22 = vld [vmem:[%s1197_s0 + $0xa0] sm:$0xff] }
  0x1e   :  { %224 = vperm.xlu1 %691, %v34_v15   ;;  %219 = vperm.xlu0 %690, %v33_v16   ;;  %v42_v23 = vld [vmem:[%s1197_s0 + $0xb8] sm:$0xff]  ;;  %v41_v24 = vld [vmem:[%s1197_s0 + $0xb0] sm:$0xff]  ;;  %v44_v25 = vld [vmem:[%s1197_s0 + $0xc8] sm:$0xff] }
  0x1f   :  { %v43_v26 = vld [vmem:[%s1197_s0 + $0xc0] sm:$0xff]  ;;  %v46_v27 = vld [vmem:[%s1197_s0 + $0xd8] sm:$0xff]  ;;  %v45_v28 = vld [vmem:[%s1197_s0 + $0xd0] sm:$0xff] }
  0x20   :  { %v48_v29 = vld [vmem:[%s1197_s0 + $0xe8] sm:$0xff]  ;;  %v47_v30 = vld [vmem:[%s1197_s0 + $0xe0] sm:$0xff]  ;;  %v50_v31 = vld [vmem:[%s1197_s0 + $0xf8] sm:$0xff] }
  0x21   :  { %v49_v32 = vld [vmem:[%s1197_s0 + $0xf0] sm:$0xff]  ;;  %v52_v33 = vld [vmem:[%s1197_s0 + $0x108] sm:$0xff]  ;;  %v51_v34 = vld [vmem:[%s1197_s0 + $0x100] sm:$0xff] }
  0x22   :  { %234 = vperm.xlu1 %691, %v36_v17   ;;  %229 = vperm.xlu0 %690, %v35_v18   ;;  %v54_v35 = vld [vmem:[%s1197_s0 + $0x118] sm:$0xff]  ;;  %v53_v36 = vld [vmem:[%s1197_s0 + $0x110] sm:$0xff]  ;;  %v56_v37 = vld [vmem:[%s1197_s0 + $0x128] sm:$0xff] }
  0x23   :  { %v55_v38 = vld [vmem:[%s1197_s0 + $0x120] sm:$0xff]  ;;  %v58_v39 = vld [vmem:[%s1197_s0 + $0x138] sm:$0xff]  ;;  %v57_v40 = vld [vmem:[%s1197_s0 + $0x130] sm:$0xff] }
  0x24   :  { %v60_v41 = vld [vmem:[%s1197_s0 + $0x148] sm:$0xff]  ;;  %v59_v42 = vld [vmem:[%s1197_s0 + $0x140] sm:$0xff]  ;;  %v62_v43 = vld [vmem:[%s1197_s0 + $0x158] sm:$0xff] }
  0x25   :  { %v61_v44 = vld [vmem:[%s1197_s0 + $0x150] sm:$0xff]  ;;  %v64_v45 = vld [vmem:[%s1197_s0 + $0x168] sm:$0xff]  ;;  %v63_v46 = vld [vmem:[%s1197_s0 + $0x160] sm:$0xff] }
  0x26   :  { %244 = vperm.xlu1 %691, %v38_v19   ;;  %239 = vperm.xlu0 %690, %v37_v20   ;;  %v66_v47 = vld [vmem:[%s1197_s0 + $0x178] sm:$0xff]  ;;  %v65_v48 = vld [vmem:[%s1197_s0 + $0x170] sm:$0xff]  ;;  %v68_v49 = vld [vmem:[%s1197_s0 + $0x188] sm:$0xff] }
  0x27   :  { %v67_v50 = vld [vmem:[%s1197_s0 + $0x180] sm:$0xff]  ;;  %v70_v51 = vld [vmem:[%s1197_s0 + $0x198] sm:$0xff]  ;;  %v69_v52 = vld [vmem:[%s1197_s0 + $0x190] sm:$0xff] }
  0x28   :  { %v72_v53 = vld [vmem:[%s1197_s0 + $0x1a8] sm:$0xff]  ;;  %v71_v54 = vld [vmem:[%s1197_s0 + $0x1a0] sm:$0xff]  ;;  %v74_v55 = vld [vmem:[%s1197_s0 + $0x1b8] sm:$0xff] }
  0x29   :  { %v73_v56 = vld [vmem:[%s1197_s0 + $0x1b0] sm:$0xff]  ;;  %v76_v57 = vld [vmem:[%s1197_s0 + $0x1c8] sm:$0xff]  ;;  %v75_v58 = vld [vmem:[%s1197_s0 + $0x1c0] sm:$0xff] }
  0x2a   :  { %254 = vperm.xlu1 %691, %v40_v21   ;;  %249 = vperm.xlu0 %690, %v39_v22   ;;  %v78_v59 = vld [vmem:[%s1197_s0 + $0x1d8] sm:$0xff]  ;;  %v77_v60 = vld [vmem:[%s1197_s0 + $0x1d0] sm:$0xff]  ;;  %v80_v61 = vld [vmem:[%s1197_s0 + $0x1e8] sm:$0xff] }
  0x2b   :  { %v79_v62 = vld [vmem:[%s1197_s0 + $0x1e0] sm:$0xff]  ;;  %v82_v63 = vld [vmem:[%s1197_s0 + $0x1f8] sm:$0xff]  ;;  %v81_v0 = vld [vmem:[%s1197_s0 + $0x1f0] sm:$0xff] }
  0x2c   :  { %v83_v2 = vld [vmem:[%s1198_s1] sm:$0xff]  ;;  %v85_v4 = vld [vmem:[%s1198_s1 + $0x10] sm:$0xff]  ;;  %v84_v5 = vld [vmem:[%s1198_s1 + $0x8] sm:$0xff] }
  0x2d   :  { %v86_v7 = vld [vmem:[%s1198_s1 + $0x18] sm:$0xff]  ;;  %v87_v12 = vld [vmem:[%s1198_s1 + $0x20] sm:$0xff]  ;;  %v88_v17 = vld [vmem:[%s1198_s1 + $0x28] sm:$0xff] }
  0x2e   :  { %264 = vperm.xlu1 %691, %v42_v23   ;;  %259 = vperm.xlu0 %690, %v41_v24   ;;  %v89_v23 = vld [vmem:[%s1198_s1 + $0x30] sm:$0xff]  ;;  %v717_v24 = vmov 0.0  }
  0x2f   :  { %17 = vst.msk [vmem:[#allocation2] sm:$0x1] %vm16_vm1, %v717_v24  ;;  %v102_v24 = vld [vmem:[%s1198_s1 + $0x98] sm:$0xff] }
  0x32   :  { %274 = vperm.xlu1 %691, %v44_v25   ;;  %269 = vperm.xlu0 %690, %v43_v26  }
  0x36   :  { %284 = vperm.xlu1 %691, %v46_v27   ;;  %279 = vperm.xlu0 %690, %v45_v28   ;;  %v90_v28 = vld [vmem:[%s1198_s1 + $0x38] sm:$0xff] }
  0x3a   :  { %294 = vperm.xlu1 %691, %v48_v29   ;;  %289 = vperm.xlu0 %690, %v47_v30  }
  0x3e   :  { %304 = vperm.xlu1 %691, %v50_v31   ;;  %299 = vperm.xlu0 %690, %v49_v32  }
  0x42   :  { %314 = vperm.xlu1 %691, %v52_v33   ;;  %309 = vperm.xlu0 %690, %v51_v34   ;;  %v91_v34 = vld [vmem:[%s1198_s1 + $0x40] sm:$0xff] }
  0x46   :  { %324 = vperm.xlu1 %691, %v54_v35   ;;  %319 = vperm.xlu0 %690, %v53_v36  }
  0x4a   :  { %334 = vperm.xlu1 %691, %v56_v37   ;;  %329 = vperm.xlu0 %690, %v55_v38   ;;  %v92_v38 = vld [vmem:[%s1198_s1 + $0x48] sm:$0xff] }
  0x4e   :  { %344 = vperm.xlu1 %691, %v58_v39   ;;  %339 = vperm.xlu0 %690, %v57_v40  }
  0x52   :  { %354 = vperm.xlu1 %691, %v60_v41   ;;  %349 = vperm.xlu0 %690, %v59_v42  }
  0x56   :  { %364 = vperm.xlu1 %691, %v62_v43   ;;  %359 = vperm.xlu0 %690, %v61_v44   ;;  %v93_v44 = vld [vmem:[%s1198_s1 + $0x50] sm:$0xff] }
  0x5a   :  { %374 = vperm.xlu1 %691, %v64_v45   ;;  %369 = vperm.xlu0 %690, %v63_v46  }
  0x5e   :  { %384 = vperm.xlu1 %691, %v66_v47   ;;  %379 = vperm.xlu0 %690, %v65_v48   ;;  %v94_v48 = vld [vmem:[%s1198_s1 + $0x58] sm:$0xff] }
  0x62   :  { %394 = vperm.xlu1 %691, %v68_v49   ;;  %389 = vperm.xlu0 %690, %v67_v50  }
  0x66   :  { %404 = vperm.xlu1 %691, %v70_v51   ;;  %399 = vperm.xlu0 %690, %v69_v52  }
  0x6a   :  { %414 = vperm.xlu1 %691, %v72_v53   ;;  %409 = vperm.xlu0 %690, %v71_v54   ;;  %v95_v54 = vld [vmem:[%s1198_s1 + $0x60] sm:$0xff] }
  0x6e   :  { %424 = vperm.xlu1 %691, %v74_v55   ;;  %419 = vperm.xlu0 %690, %v73_v56  }
  0x72   :  { %434 = vperm.xlu1 %691, %v76_v57   ;;  %429 = vperm.xlu0 %690, %v75_v58   ;;  %v96_v58 = vld [vmem:[%s1198_s1 + $0x68] sm:$0xff] }
  0x76   :  { %444 = vperm.xlu1 %691, %v78_v59   ;;  %439 = vperm.xlu0 %690, %v77_v60  }
  0x7a   :  { %454 = vperm.xlu1 %691, %v80_v61   ;;  %449 = vperm.xlu0 %690, %v79_v62  }
  0x7e   :  { %464 = vperm.xlu1 %691, %v82_v63   ;;  %459 = vperm.xlu0 %690, %v81_v0   ;;  %v97_v0 = vld [vmem:[%s1198_s1 + $0x70] sm:$0xff] }
  0x81   :  { %v160_v1 = vpop.permute.xlu1 %159  ;;  %v150_v3 = vpop.permute.xlu0 %149 }
  0x82   :  { %v467_v6 = vmul.f32 %v150_v3, %v83_v2  ;;  %v469_v10 = vmul.f32 %v160_v1, %v85_v4  ;;  %v98_v4 = vld [vmem:[%s1198_s1 + $0x78] sm:$0xff] }
  0x84   :  { %v532_v13 = vsel %vm531_vm0, %v467_v6, 0.0  ;;  %v535_v20 = vsel %vm531_vm0, %v469_v10, 0.0  ;;  %v99_v10 = vld [vmem:[%s1198_s1 + $0x80] sm:$0xff] }
  0x85   :  { %v165_v8 = vpop.permute.xlu1 %164  ;;  %v155_v9 = vpop.permute.xlu0 %154 }
  0x86   :  { %v468_v11 = vmul.f32 %v155_v9, %v84_v5  ;;  %v470_v14 = vmul.f32 %v165_v8, %v86_v7 }
  0x88   :  { %v533_v15 = vsel %vm531_vm0, %v468_v11, 0.0  ;;  %v537_v25 = vsel %vm531_vm0, %v470_v14, 0.0  ;;  %v100_v14 = vld [vmem:[%s1198_s1 + $0x88] sm:$0xff] }
  0x89   :  { %v534_v16 = vadd.f32 %v533_v15, %v532_v13  ;;  %v175_v18 = vpop.permute.xlu1 %174  ;;  %v170_v19 = vpop.permute.xlu0 %169 }
  0x8a   :  { %v471_v21 = vmul.f32 %v170_v19, %v87_v12  ;;  %v472_v26 = vmul.f32 %v175_v18, %v88_v17 }
  0x8b   :  { %v536_v22 = vadd.f32 %v535_v20, %v534_v16  ;;  %v101_v20 = vld [vmem:[%s1198_s1 + $0x90] sm:$0xff] }
  0x8c   :  { %v539_v31 = vsel %vm531_vm0, %v471_v21, 0.0  ;;  %v541_v35 = vsel %vm531_vm0, %v472_v26, 0.0 }
  0x8d   :  { %v538_v27 = vadd.f32 %v537_v25, %v536_v22  ;;  %v185_v29 = vpop.permute.xlu1 %184  ;;  %v180_v30 = vpop.permute.xlu0 %179 }
  0x8e   :  { %v473_v32 = vmul.f32 %v180_v30, %v89_v23  ;;  %v474_v36 = vmul.f32 %v185_v29, %v90_v28  ;;  %v103_v30 = vld [vmem:[%s1198_s1 + $0xa0] sm:$0xff] }
  0x8f   :  { %v540_v33 = vadd.f32 %v539_v31, %v538_v27 }
  0x90   :  { %v543_v41 = vsel %vm531_vm0, %v473_v32, 0.0  ;;  %v545_v45 = vsel %vm531_vm0, %v474_v36, 0.0 }
  0x91   :  { %v542_v37 = vadd.f32 %v541_v35, %v540_v33  ;;  %v195_v39 = vpop.permute.xlu1 %194  ;;  %v190_v40 = vpop.permute.xlu0 %189 }
  0x92   :  { %v475_v42 = vmul.f32 %v190_v40, %v91_v34  ;;  %v476_v46 = vmul.f32 %v195_v39, %v92_v38  ;;  %v104_v34 = vld [vmem:[%s1198_s1 + $0xa8] sm:$0xff]  ;;  %v105_v40 = vld [vmem:[%s1198_s1 + $0xb0] sm:$0xff] }
  0x93   :  { %v544_v43 = vadd.f32 %v543_v41, %v542_v37 }
  0x94   :  { %v547_v51 = vsel %vm531_vm0, %v475_v42, 0.0  ;;  %v549_v55 = vsel %vm531_vm0, %v476_v46, 0.0 }
  0x95   :  { %v546_v47 = vadd.f32 %v545_v45, %v544_v43  ;;  %v205_v49 = vpop.permute.xlu1 %204  ;;  %v200_v50 = vpop.permute.xlu0 %199 }
  0x96   :  { %v477_v52 = vmul.f32 %v200_v50, %v93_v44  ;;  %v478_v56 = vmul.f32 %v205_v49, %v94_v48  ;;  %v106_v44 = vld [vmem:[%s1198_s1 + $0xb8] sm:$0xff]  ;;  %v107_v50 = vld [vmem:[%s1198_s1 + $0xc0] sm:$0xff] }
  0x97   :  { %v548_v53 = vadd.f32 %v547_v51, %v546_v47 }
  0x98   :  { %v551_v61 = vsel %vm531_vm0, %v477_v52, 0.0  ;;  %v553_v1 = vsel %vm531_vm0, %v478_v56, 0.0 }
  0x99   :  { %v550_v57 = vadd.f32 %v549_v55, %v548_v53  ;;  %v215_v59 = vpop.permute.xlu1 %214  ;;  %v210_v60 = vpop.permute.xlu0 %209 }
  0x9a   :  { %v479_v62 = vmul.f32 %v210_v60, %v95_v54  ;;  %v480_v2 = vmul.f32 %v215_v59, %v96_v58  ;;  %v108_v54 = vld [vmem:[%s1198_s1 + $0xc8] sm:$0xff]  ;;  %v109_v60 = vld [vmem:[%s1198_s1 + $0xd0] sm:$0xff] }
  0x9b   :  { %v552_v63 = vadd.f32 %v551_v61, %v550_v57 }
  0x9c   :  { %v555_v7 = vsel %vm531_vm0, %v479_v62, 0.0  ;;  %v557_v11 = vsel %vm531_vm0, %v480_v2, 0.0 }
  0x9d   :  { %v554_v3 = vadd.f32 %v553_v1, %v552_v63  ;;  %v225_v5 = vpop.permute.xlu1 %224  ;;  %v220_v6 = vpop.permute.xlu0 %219 }
  0x9e   :  { %v481_v8 = vmul.f32 %v220_v6, %v97_v0  ;;  %v482_v12 = vmul.f32 %v225_v5, %v98_v4  ;;  %v110_v0 = vld [vmem:[%s1198_s1 + $0xd8] sm:$0xff]  ;;  %v111_v6 = vld [vmem:[%s1198_s1 + $0xe0] sm:$0xff] }
  0x9f   :  { %v556_v9 = vadd.f32 %v555_v7, %v554_v3 }
  0xa0   :  { %v559_v17 = vsel %vm531_vm0, %v481_v8, 0.0  ;;  %v561_v21 = vsel %vm531_vm0, %v482_v12, 0.0 }
  0xa1   :  { %v558_v13 = vadd.f32 %v557_v11, %v556_v9  ;;  %v235_v15 = vpop.permute.xlu1 %234  ;;  %v230_v16 = vpop.permute.xlu0 %229 }
  0xa2   :  { %v483_v18 = vmul.f32 %v230_v16, %v99_v10  ;;  %v484_v22 = vmul.f32 %v235_v15, %v100_v14  ;;  %v112_v10 = vld [vmem:[%s1198_s1 + $0xe8] sm:$0xff]  ;;  %v113_v16 = vld [vmem:[%s1198_s1 + $0xf0] sm:$0xff] }
  0xa3   :  { %v560_v19 = vadd.f32 %v559_v17, %v558_v13 }
  0xa4   :  { %v563_v27 = vsel %vm531_vm0, %v483_v18, 0.0  ;;  %v565_v31 = vsel %vm531_vm0, %v484_v22, 0.0 }
  0xa5   :  { %v562_v23 = vadd.f32 %v561_v21, %v560_v19  ;;  %v245_v25 = vpop.permute.xlu1 %244  ;;  %v240_v26 = vpop.permute.xlu0 %239 }
  0xa6   :  { %v485_v28 = vmul.f32 %v240_v26, %v101_v20  ;;  %v486_v32 = vmul.f32 %v245_v25, %v102_v24  ;;  %v114_v20 = vld [vmem:[%s1198_s1 + $0xf8] sm:$0xff]  ;;  %v115_v26 = vld [vmem:[%s1198_s1 + $0x100] sm:$0xff] }
  0xa7   :  { %v564_v29 = vadd.f32 %v563_v27, %v562_v23 }
  0xa8   :  { %v567_v37 = vsel %vm531_vm0, %v485_v28, 0.0  ;;  %v569_v41 = vsel %vm531_vm0, %v486_v32, 0.0 }
  0xa9   :  { %v566_v33 = vadd.f32 %v565_v31, %v564_v29  ;;  %v255_v35 = vpop.permute.xlu1 %254  ;;  %v250_v36 = vpop.permute.xlu0 %249 }
  0xaa   :  { %v487_v38 = vmul.f32 %v250_v36, %v103_v30  ;;  %v488_v42 = vmul.f32 %v255_v35, %v104_v34  ;;  %v116_v30 = vld [vmem:[%s1198_s1 + $0x108] sm:$0xff]  ;;  %v117_v36 = vld [vmem:[%s1198_s1 + $0x110] sm:$0xff] }
  0xab   :  { %v568_v39 = vadd.f32 %v567_v37, %v566_v33 }
  0xac   :  { %v571_v47 = vsel %vm531_vm0, %v487_v38, 0.0  ;;  %v573_v51 = vsel %vm531_vm0, %v488_v42, 0.0 }
  0xad   :  { %v570_v43 = vadd.f32 %v569_v41, %v568_v39  ;;  %v265_v45 = vpop.permute.xlu1 %264  ;;  %v260_v46 = vpop.permute.xlu0 %259 }
  0xae   :  { %v489_v48 = vmul.f32 %v260_v46, %v105_v40  ;;  %v490_v52 = vmul.f32 %v265_v45, %v106_v44  ;;  %v118_v40 = vld [vmem:[%s1198_s1 + $0x118] sm:$0xff]  ;;  %v119_v46 = vld [vmem:[%s1198_s1 + $0x120] sm:$0xff] }
  0xaf   :  { %v572_v49 = vadd.f32 %v571_v47, %v570_v43 }
  0xb0   :  { %v575_v57 = vsel %vm531_vm0, %v489_v48, 0.0  ;;  %v577_v61 = vsel %vm531_vm0, %v490_v52, 0.0 }
  0xb1   :  { %v574_v53 = vadd.f32 %v573_v51, %v572_v49  ;;  %v275_v55 = vpop.permute.xlu1 %274  ;;  %v270_v56 = vpop.permute.xlu0 %269 }
  0xb2   :  { %v491_v58 = vmul.f32 %v270_v56, %v107_v50  ;;  %v492_v62 = vmul.f32 %v275_v55, %v108_v54  ;;  %v120_v50 = vld [vmem:[%s1198_s1 + $0x128] sm:$0xff]  ;;  %v121_v56 = vld [vmem:[%s1198_s1 + $0x130] sm:$0xff] }
  0xb3   :  { %v576_v59 = vadd.f32 %v575_v57, %v574_v53 }
  0xb4   :  { %v579_v3 = vsel %vm531_vm0, %v491_v58, 0.0  ;;  %v581_v7 = vsel %vm531_vm0, %v492_v62, 0.0 }
  0xb5   :  { %v578_v63 = vadd.f32 %v577_v61, %v576_v59  ;;  %v285_v1 = vpop.permute.xlu1 %284  ;;  %v280_v2 = vpop.permute.xlu0 %279 }
  0xb6   :  { %v493_v4 = vmul.f32 %v280_v2, %v109_v60  ;;  %v494_v8 = vmul.f32 %v285_v1, %v110_v0  ;;  %v122_v60 = vld [vmem:[%s1198_s1 + $0x138] sm:$0xff]  ;;  %v123_v2 = vld [vmem:[%s1198_s1 + $0x140] sm:$0xff] }
  0xb7   :  { %v580_v5 = vadd.f32 %v579_v3, %v578_v63 }
  0xb8   :  { %v583_v13 = vsel %vm531_vm0, %v493_v4, 0.0  ;;  %v585_v17 = vsel %vm531_vm0, %v494_v8, 0.0 }
  0xb9   :  { %v582_v9 = vadd.f32 %v581_v7, %v580_v5  ;;  %v295_v11 = vpop.permute.xlu1 %294  ;;  %v290_v12 = vpop.permute.xlu0 %289 }
  0xba   :  { %v495_v14 = vmul.f32 %v290_v12, %v111_v6  ;;  %v496_v18 = vmul.f32 %v295_v11, %v112_v10  ;;  %v124_v6 = vld [vmem:[%s1198_s1 + $0x148] sm:$0xff]  ;;  %v125_v12 = vld [vmem:[%s1198_s1 + $0x150] sm:$0xff] }
  0xbb   :  { %v584_v15 = vadd.f32 %v583_v13, %v582_v9 }
  0xbc   :  { %v587_v23 = vsel %vm531_vm0, %v495_v14, 0.0  ;;  %v589_v27 = vsel %vm531_vm0, %v496_v18, 0.0 }
  0xbd   :  { %v586_v19 = vadd.f32 %v585_v17, %v584_v15  ;;  %v305_v21 = vpop.permute.xlu1 %304  ;;  %v300_v22 = vpop.permute.xlu0 %299 }
  0xbe   :  { %v497_v24 = vmul.f32 %v300_v22, %v113_v16  ;;  %v498_v28 = vmul.f32 %v305_v21, %v114_v20  ;;  %v126_v16 = vld [vmem:[%s1198_s1 + $0x158] sm:$0xff]  ;;  %v127_v22 = vld [vmem:[%s1198_s1 + $0x160] sm:$0xff] }
  0xbf   :  { %v588_v25 = vadd.f32 %v587_v23, %v586_v19 }
  0xc0   :  { %v591_v33 = vsel %vm531_vm0, %v497_v24, 0.0  ;;  %v593_v37 = vsel %vm531_vm0, %v498_v28, 0.0 }
  0xc1   :  { %v590_v29 = vadd.f32 %v589_v27, %v588_v25  ;;  %v315_v31 = vpop.permute.xlu1 %314  ;;  %v310_v32 = vpop.permute.xlu0 %309 }
  0xc2   :  { %v499_v34 = vmul.f32 %v310_v32, %v115_v26  ;;  %v500_v38 = vmul.f32 %v315_v31, %v116_v30  ;;  %v128_v26 = vld [vmem:[%s1198_s1 + $0x168] sm:$0xff]  ;;  %v129_v32 = vld [vmem:[%s1198_s1 + $0x170] sm:$0xff] }
  0xc3   :  { %v592_v35 = vadd.f32 %v591_v33, %v590_v29 }
  0xc4   :  { %v595_v43 = vsel %vm531_vm0, %v499_v34, 0.0  ;;  %v597_v47 = vsel %vm531_vm0, %v500_v38, 0.0 }
  0xc5   :  { %v594_v39 = vadd.f32 %v593_v37, %v592_v35  ;;  %v325_v41 = vpop.permute.xlu1 %324  ;;  %v320_v42 = vpop.permute.xlu0 %319 }
  0xc6   :  { %v501_v44 = vmul.f32 %v320_v42, %v117_v36  ;;  %v502_v48 = vmul.f32 %v325_v41, %v118_v40  ;;  %v130_v36 = vld [vmem:[%s1198_s1 + $0x178] sm:$0xff]  ;;  %v131_v42 = vld [vmem:[%s1198_s1 + $0x180] sm:$0xff] }
  0xc7   :  { %v596_v45 = vadd.f32 %v595_v43, %v594_v39 }
  0xc8   :  { %v599_v53 = vsel %vm531_vm0, %v501_v44, 0.0  ;;  %v601_v57 = vsel %vm531_vm0, %v502_v48, 0.0 }
  0xc9   :  { %v598_v49 = vadd.f32 %v597_v47, %v596_v45  ;;  %v335_v51 = vpop.permute.xlu1 %334  ;;  %v330_v52 = vpop.permute.xlu0 %329 }
  0xca   :  { %v503_v54 = vmul.f32 %v330_v52, %v119_v46  ;;  %v504_v58 = vmul.f32 %v335_v51, %v120_v50  ;;  %v132_v46 = vld [vmem:[%s1198_s1 + $0x188] sm:$0xff]  ;;  %v133_v52 = vld [vmem:[%s1198_s1 + $0x190] sm:$0xff] }
  0xcb   :  { %v600_v55 = vadd.f32 %v599_v53, %v598_v49 }
  0xcc   :  { %v603_v63 = vsel %vm531_vm0, %v503_v54, 0.0  ;;  %v605_v3 = vsel %vm531_vm0, %v504_v58, 0.0 }
  0xcd   :  { %v602_v59 = vadd.f32 %v601_v57, %v600_v55  ;;  %v345_v61 = vpop.permute.xlu1 %344  ;;  %v340_v62 = vpop.permute.xlu0 %339 }
  0xce   :  { %v505_v0 = vmul.f32 %v340_v62, %v121_v56  ;;  %v506_v4 = vmul.f32 %v345_v61, %v122_v60  ;;  %v134_v56 = vld [vmem:[%s1198_s1 + $0x198] sm:$0xff]  ;;  %v135_v62 = vld [vmem:[%s1198_s1 + $0x1a0] sm:$0xff] }
  0xcf   :  { %v604_v1 = vadd.f32 %v603_v63, %v602_v59 }
  0xd0   :  { %v607_v9 = vsel %vm531_vm0, %v505_v0, 0.0  ;;  %v609_v13 = vsel %vm531_vm0, %v506_v4, 0.0 }
  0xd1   :  { %v606_v5 = vadd.f32 %v605_v3, %v604_v1  ;;  %v355_v7 = vpop.permute.xlu1 %354  ;;  %v350_v8 = vpop.permute.xlu0 %349 }
  0xd2   :  { %v507_v10 = vmul.f32 %v350_v8, %v123_v2  ;;  %v508_v14 = vmul.f32 %v355_v7, %v124_v6  ;;  %v136_v2 = vld [vmem:[%s1198_s1 + $0x1a8] sm:$0xff]  ;;  %v137_v8 = vld [vmem:[%s1198_s1 + $0x1b0] sm:$0xff] }
  0xd3   :  { %v608_v11 = vadd.f32 %v607_v9, %v606_v5 }
  0xd4   :  { %v611_v19 = vsel %vm531_vm0, %v507_v10, 0.0  ;;  %v613_v23 = vsel %vm531_vm0, %v508_v14, 0.0 }
  0xd5   :  { %v610_v15 = vadd.f32 %v609_v13, %v608_v11  ;;  %v365_v17 = vpop.permute.xlu1 %364  ;;  %v360_v18 = vpop.permute.xlu0 %359 }
  0xd6   :  { %v509_v20 = vmul.f32 %v360_v18, %v125_v12  ;;  %v510_v24 = vmul.f32 %v365_v17, %v126_v16  ;;  %v138_v12 = vld [vmem:[%s1198_s1 + $0x1b8] sm:$0xff]  ;;  %v139_v18 = vld [vmem:[%s1198_s1 + $0x1c0] sm:$0xff] }
  0xd7   :  { %v612_v21 = vadd.f32 %v611_v19, %v610_v15 }
  0xd8   :  { %v615_v29 = vsel %vm531_vm0, %v509_v20, 0.0  ;;  %v617_v33 = vsel %vm531_vm0, %v510_v24, 0.0 }
  0xd9   :  { %v614_v25 = vadd.f32 %v613_v23, %v612_v21  ;;  %v375_v27 = vpop.permute.xlu1 %374  ;;  %v370_v28 = vpop.permute.xlu0 %369 }
  0xda   :  { %v511_v30 = vmul.f32 %v370_v28, %v127_v22  ;;  %v512_v34 = vmul.f32 %v375_v27, %v128_v26  ;;  %v140_v22 = vld [vmem:[%s1198_s1 + $0x1c8] sm:$0xff]  ;;  %v141_v28 = vld [vmem:[%s1198_s1 + $0x1d0] sm:$0xff] }
  0xdb   :  { %v616_v31 = vadd.f32 %v615_v29, %v614_v25 }
  0xdc   :  { %v619_v39 = vsel %vm531_vm0, %v511_v30, 0.0  ;;  %v621_v43 = vsel %vm531_vm0, %v512_v34, 0.0 }
  0xdd   :  { %v618_v35 = vadd.f32 %v617_v33, %v616_v31  ;;  %v385_v37 = vpop.permute.xlu1 %384  ;;  %v380_v38 = vpop.permute.xlu0 %379 }
  0xde   :  { %v513_v40 = vmul.f32 %v380_v38, %v129_v32  ;;  %v514_v44 = vmul.f32 %v385_v37, %v130_v36  ;;  %v142_v32 = vld [vmem:[%s1198_s1 + $0x1d8] sm:$0xff]  ;;  %v143_v38 = vld [vmem:[%s1198_s1 + $0x1e0] sm:$0xff] }
  0xdf   :  { %v620_v41 = vadd.f32 %v619_v39, %v618_v35 }
  0xe0   :  { %v623_v49 = vsel %vm531_vm0, %v513_v40, 0.0  ;;  %v625_v53 = vsel %vm531_vm0, %v514_v44, 0.0 }
  0xe1   :  { %v622_v45 = vadd.f32 %v621_v43, %v620_v41  ;;  %v395_v47 = vpop.permute.xlu1 %394  ;;  %v390_v48 = vpop.permute.xlu0 %389 }
  0xe2   :  { %v515_v50 = vmul.f32 %v390_v48, %v131_v42  ;;  %v516_v54 = vmul.f32 %v395_v47, %v132_v46  ;;  %v144_v42 = vld [vmem:[%s1198_s1 + $0x1e8] sm:$0xff]  ;;  %v145_v48 = vld [vmem:[%s1198_s1 + $0x1f0] sm:$0xff] }
  0xe3   :  { %v624_v51 = vadd.f32 %v623_v49, %v622_v45 }
  0xe4   :  { %v627_v59 = vsel %vm531_vm0, %v515_v50, 0.0  ;;  %v629_v63 = vsel %vm531_vm0, %v516_v54, 0.0 }
  0xe5   :  { %v626_v55 = vadd.f32 %v625_v53, %v624_v51  ;;  %v405_v57 = vpop.permute.xlu1 %404  ;;  %v400_v58 = vpop.permute.xlu0 %399 }
  0xe6   :  { %v517_v60 = vmul.f32 %v400_v58, %v133_v52  ;;  %v518_v0 = vmul.f32 %v405_v57, %v134_v56  ;;  %v146_v52 = vld [vmem:[%s1198_s1 + $0x1f8] sm:$0xff]  ;;  %s718_s1 = smov [#allocation3]  }
  0xe7   :  { %v628_v61 = vadd.f32 %v627_v59, %v626_v55  ;;  %s679_s8 = sshll.u32 %s718_s1, 4  ;;  %s680_s8 = int_to_ptr.vmem [resolvable:$true] %s679_s8 }
  0xe8   :  { %v631_v5 = vsel %vm531_vm0, %v517_v60, 0.0  ;;  %v633_v9 = vsel %vm531_vm0, %v518_v0, 0.0  ;;  %s692_s9 = scalar_lea.vmem %s680_s8, 16  ;;  %s696_s10 = scalar_lea.vmem %s680_s8, 32 }
  0xe9   :  { %v630_v1 = vadd.f32 %v629_v63, %v628_v61  ;;  %v415_v3 = vpop.permute.xlu1 %414  ;;  %v410_v4 = vpop.permute.xlu0 %409  ;;  %p693_p0 = scmp.ne.s32.totalorder %s680_s8, %s692_s9  ;;  %p697_p1 = scmp.lt.s32.totalorder %s680_s8, %s680_s8 }
  0xea   :  { %v519_v6 = vmul.f32 %v410_v4, %v135_v62  ;;  %v520_v10 = vmul.f32 %v415_v3, %v136_v2  ;;  %p698_p2 = scmp.lt.s32.totalorder %s696_s10, %s692_s9 }
  0xeb   :  { %v632_v7 = vadd.f32 %v631_v5, %v630_v1 }
  0xec   :  { %v635_v15 = vsel %vm531_vm0, %v519_v6, 0.0  ;;  %v637_v19 = vsel %vm531_vm0, %v520_v10, 0.0  ;;  %v18_v6 = vld [vmem:[#allocation2] sm:$0x1]  ;;  %p699_p3 = por %p698_p2, %p697_p1 }
  0xed   :  { %v634_v11 = vadd.f32 %v633_v9, %v632_v7  ;;  %v425_v13 = vpop.permute.xlu1 %424  ;;  %v420_v14 = vpop.permute.xlu0 %419 }
  0xee   :  { %v521_v16 = vmul.f32 %v420_v14, %v137_v8  ;;  %v522_v20 = vmul.f32 %v425_v13, %v138_v12  ;;  %p700_p4 = pnand %p699_p3, %p693_p0 }
  0xef   :  { %v636_v17 = vadd.f32 %v635_v15, %v634_v11 }
  0xf0   :  { %v639_v25 = vsel %vm531_vm0, %v521_v16, 0.0  ;;  %v641_v29 = vsel %vm531_vm0, %v522_v20, 0.0 }
  0xf1   :  { %v638_v21 = vadd.f32 %v637_v19, %v636_v17  ;;  %v435_v23 = vpop.permute.xlu1 %434  ;;  %v430_v24 = vpop.permute.xlu0 %429 }
  0xf2   :  { %v523_v26 = vmul.f32 %v430_v24, %v139_v18  ;;  %v524_v30 = vmul.f32 %v435_v23, %v140_v22 }
  0xf3   :  { %v640_v27 = vadd.f32 %v639_v25, %v638_v21 }
  0xf4   :  { %v643_v35 = vsel %vm531_vm0, %v523_v26, 0.0  ;;  %v645_v39 = vsel %vm531_vm0, %v524_v30, 0.0 }
  0xf5   :  { %v642_v31 = vadd.f32 %v641_v29, %v640_v27  ;;  %v445_v33 = vpop.permute.xlu1 %444  ;;  %v440_v34 = vpop.permute.xlu0 %439 }
  0xf6   :  { %v525_v36 = vmul.f32 %v440_v34, %v141_v28  ;;  %v526_v40 = vmul.f32 %v445_v33, %v142_v32 }
  0xf7   :  { %v644_v37 = vadd.f32 %v643_v35, %v642_v31 }
  0xf8   :  { %v647_v45 = vsel %vm531_vm0, %v525_v36, 0.0  ;;  %v649_v49 = vsel %vm531_vm0, %v526_v40, 0.0 }
  0xf9   :  { %v646_v41 = vadd.f32 %v645_v39, %v644_v37  ;;  %v455_v43 = vpop.permute.xlu1 %454  ;;  %v450_v44 = vpop.permute.xlu0 %449 }
  0xfa   :  { %v527_v46 = vmul.f32 %v450_v44, %v143_v38  ;;  %v528_v50 = vmul.f32 %v455_v43, %v144_v42 }
  0xfb   :  { %v648_v47 = vadd.f32 %v647_v45, %v646_v41 }
  0xfc   :  { %v651_v55 = vsel %vm531_vm0, %v527_v46, 0.0  ;;  %v653_v58 = vsel %vm531_vm0, %v528_v50, 0.0 }
  0xfd   :  { %v650_v51 = vadd.f32 %v649_v49, %v648_v47  ;;  %v465_v53 = vpop.permute.xlu1 %464  ;;  %v460_v54 = vpop.permute.xlu0 %459 }
  0xfe   :  { %v529_v56 = vmul.f32 %v460_v54, %v145_v48  ;;  %v530_v59 = vmul.f32 %v465_v53, %v146_v52 }
  0xff   :  { %v652_v57 = vadd.f32 %v651_v55, %v650_v51 }
 0x100   :  { %v655_v61 = vsel %vm531_vm0, %v529_v56, 0.0  ;;  %v657_v63 = vsel %vm531_vm0, %v530_v59, 0.0 }
 0x101   :  { %v654_v60 = vadd.f32 %v653_v58, %v652_v57 }
 0x103   :  { %v656_v62 = vadd.f32 %v655_v61, %v654_v60 }
 0x105   :  { %v658_v0 = vadd.f32 %v657_v63, %v656_v62 }
 0x107   :  { %v659_v1 = vrot.slane %v658_v0, 4 }
 0x109   :  { %v660_v2 = vadd.f32 %v659_v1, %v658_v0 }
 0x10b   :  { %v661_v3 = vrot.slane %v660_v2, 2 }
 0x10d   :  { %v662_v4 = vadd.f32 %v661_v3, %v660_v2 }
 0x10f   :  { %v663_v5 = vrot.slane %v662_v4, 1 }
 0x111   :  { %v664_v7 = vadd.f32 %v663_v5, %v662_v4 }
 0x113   :  { %v665_v8 = vadd.f32 %v664_v7, %v18_v6 }
 0x115   :  { %667 = vst.msk [vmem:[#allocation2] sm:$0x1] %vm16_vm1, %v665_v8 }
 0x11c   :  { %v671_v9 = vld [vmem:[#allocation2] sm:$0x1] }
 0x11d   :  { %672 = vst.msk [vmem:[#allocation3] sm:$0x1] %vm16_vm1, %v671_v9 }
 0x11e   :  { %703 = shalt.err (!%p700_p4)
}
 0x11f   :  { %s704_s13 = scalar_lea.hbm %s1199_s2, 16 }
 0x120   :  { %p705_p5 = scmp.ne.s32.totalorder %s1199_s2, %s704_s13  ;;  %p708_p6 = scmp.lt.u32.totalorder %s704_s13, %s1199_s2 }
 0x122   :  { %p710_p7 = pnand %p708_p6, %p705_p5 }
 0x124   :  { %713 = shalt.err (!%p710_p7)
}
 0x125   :  { %682 = dma.vmem_to_hbm [thread:$0]  %s680_s8, 16, %s1199_s2, [#allocation4]  }
 0x126   :  { %714 = dma.done.wait [#allocation4], 16  }
 0x127   :  { %715 = vsyncadd [#allocation4], 4294967280 }
 0x128   :  { %686 = vsyncpa [#allocation4], 1 }

</bundles_post_ra>
